<compile_context>
chip_gen: v5e
topology: v5e:2x2
jax: 0.10.0
libtpu: 0.0.40
codegen_flags: <defaults>
</compile_context>

<pallas_src>
import functools

import jax
import jax.numpy as jnp
from jax.experimental import pallas as pl
from jax.experimental.pallas import tpu as pltpu

LANE = 128


def _round_up(x, m):
    return (x + m - 1) // m * m


def _pad2d(x, rows, cols, dtype=None):
    y = jnp.pad(x, ((0, rows - x.shape[0]), (0, cols - x.shape[1])))
    return y.astype(dtype) if dtype is not None else y


def _maybe_vmem_limit(needed_bytes):
    # Leave the generation-dependent scoped default (16 MiB v5e / 32 MiB
    # v6e,v7x) alone unless the resident operands + tiles actually need more.
    if needed_bytes <= 12 * 1024 * 1024:
        return None
    return int(needed_bytes) + 4 * 1024 * 1024


# ----------------------------- Pallas kernels ------------------------------

def _graph_conv_kernel(a_ref, x_ref, w_ref, b_ref, o_ref, acc_ref,
                       *, tile_k, apply_relu):
    """One (row-tile, k-tile) step of H = A @ (X @ W) + b  (optional ReLU)."""
    k = pl.program_id(1)

    @pl.when(k == 0)
    def _init():
        acc_ref[...] = jnp.zeros_like(acc_ref)

    # Recompute the k-th tile of XW from the VMEM-resident X and W.  This
    # removes the XW HBM write + (n/tile_m)x re-read of the unfused version;
    # the recompute is MXU-cheap and the kernel is HBM-bound on the A stream.
    row0 = pl.multiple_of(k * tile_k, tile_k)
    x_tile = x_ref[pl.ds(row0, tile_k), :]
    xw = jnp.dot(x_tile, w_ref[...], preferred_element_type=jnp.float32)
    acc_ref[...] += jnp.dot(a_ref[...], xw.astype(jnp.bfloat16),
                            preferred_element_type=jnp.float32)

    @pl.when(k == pl.num_programs(1) - 1)
    def _finalize():
        h = acc_ref[...] + b_ref[...]
        if apply_relu:
            h = jnp.maximum(h, 0.0)
        o_ref[...] = h.astype(o_ref.dtype)


def graph_conv(a_norm, x, w, b, *, apply_relu, tile_m=256, tile_k=256):
    """Fused GraphConv: H = A_norm @ (X @ W) + b, tiled over (rows, reduction).

    a_norm: (N_pad, N_pad) bf16; x: (N_pad, in_f) bf16; w: (in_f, F) bf16;
    b: (1, F) f32.  N_pad must be divisible by tile_m and tile_k.
    """
    n = a_norm.shape[0]
    in_f = x.shape[1]
    f = w.shape[1]
    assert n % tile_m == 0 and n % tile_k == 0, (n, tile_m, tile_k)
    assert x.shape[0] == n and w.shape[0] == in_f and b.shape == (1, f)

    kern = functools.partial(_graph_conv_kernel, tile_k=tile_k,
                             apply_relu=apply_relu)
    # VMEM: A double-buffered tiles + resident X, W + out double-buffer + acc.
    vmem_needed = (2 * tile_m * tile_k * 2 + n * in_f * 2 + in_f * f * 2
                   + f * 4 + 2 * tile_m * f * 2 + tile_m * f * 4)
    return pl.pallas_call(
        kern,
        out_shape=jax.ShapeDtypeStruct((n, f), jnp.bfloat16),
        grid=(n // tile_m, n // tile_k),
        in_specs=[
            pl.BlockSpec((tile_m, tile_k), lambda i, k: (i, k)),  # A tile
            pl.BlockSpec((n, in_f), lambda i, k: (0, 0)),         # X resident
            pl.BlockSpec((in_f, f), lambda i, k: (0, 0)),         # W resident
            pl.BlockSpec((1, f), lambda i, k: (0, 0)),            # bias
        ],
        out_specs=pl.BlockSpec((tile_m, f), lambda i, k: (i, 0)),
        scratch_shapes=[pltpu.VMEM((tile_m, f), jnp.float32)],
        compiler_params=pltpu.CompilerParams(
            dimension_semantics=("parallel", "arbitrary"),
            vmem_limit_bytes=_maybe_vmem_limit(vmem_needed)),
        cost_estimate=pl.CostEstimate(
            flops=2 * n * n * f + (n // tile_m) * 2 * n * in_f * f,
            transcendentals=0,
            bytes_accessed=(2 * n * n            # A (bf16, streamed once)
                            + 2 * n * in_f       # X (resident, read once)
                            + 2 * in_f * f       # W
                            + 4 * f              # bias (f32)
                            + 2 * n * f)),       # out (bf16)
    )(a_norm, x, w, b)


def _edge_mlp_kernel(src_ref, dst_ref, h_ref, w1s_ref, w1d_ref, b1_ref,
                     w2_ref, b2_ref, w3_ref, o_ref, hs_scr, hd_scr, *, tile_e):
    """Per edge-tile: gather endpoint features from resident h, then the MLP."""
    base = pl.program_id(0) * tile_e

    # In-kernel row gather: indices from SMEM (scalar prefetch), rows from the
    # VMEM-resident h, into VMEM scratch.  Padded edges use index 0 (valid).
    @pl.loop(0, tile_e)
    def _gather(r):
        s = src_ref[base + r]
        d = dst_ref[base + r]
        hs_scr[pl.ds(r, 1), :] = h_ref[pl.ds(s, 1), :]
        hd_scr[pl.ds(r, 1), :] = h_ref[pl.ds(d, 1), :]

    # hidden_1 = sigmoid(concat([h_src, h_dst], 1) @ W1^T + b1)
    #          = sigmoid(h_src @ W1s + h_dst @ W1d + b1)
    h1 = jnp.dot(hs_scr[...], w1s_ref[...], preferred_element_type=jnp.float32)
    h1 = h1 + jnp.dot(hd_scr[...], w1d_ref[...],
                      preferred_element_type=jnp.float32)
    h1 = jax.nn.sigmoid(h1 + b1_ref[...])
    # hidden_2 = sigmoid(hidden_1 @ W2^T + b2)
    h2 = jnp.dot(h1.astype(jnp.bfloat16), w2_ref[...],
                 preferred_element_type=jnp.float32)
    h2 = jax.nn.sigmoid(h2 + b2_ref[...])
    # output = hidden_2 @ W3^T (no bias).  W3 is zero-padded to (eta_pad, 128)
    # so the store is a full lane-dense (tile_e, 128) slab; column 0 is real.
    o_ref[...] = jnp.dot(h2.astype(jnp.bfloat16), w3_ref[...],
                         preferred_element_type=jnp.float32).astype(o_ref.dtype)


def edge_mlp(h, edges_src_pad, edges_dst_pad, w1s, w1d, b1, w2, b2, w3_pad,
             *, tile_e=128):
    """Fused edge gather + 3-layer MLP.  h: (N_pad, F) bf16, resident in VMEM.

    edges_*_pad: (E_pad,) int32, padded with 0 (a valid row index).
    Returns a lane-dense (E_pad, 128) bf16 slab; column 0 holds the result.
    """
    n, f = h.shape
    e_pad = edges_src_pad.shape[0]
    eta = w2.shape[1]
    assert e_pad % tile_e == 0

    kern = functools.partial(_edge_mlp_kernel, tile_e=tile_e)
    vmem_needed = (n * f * 2 + 2 * (2 * f * eta + eta * eta + eta * LANE)
                   + 2 * tile_e * LANE * 2 + 2 * tile_e * f * 2)
    grid_spec = pltpu.PrefetchScalarGridSpec(
        num_scalar_prefetch=2,          # edges_src, edges_dst -> SMEM
        grid=(e_pad // tile_e,),
        in_specs=[
            pl.BlockSpec((n, f), lambda i, src, dst: (0, 0)),       # h resident
            pl.BlockSpec((f, eta), lambda i, src, dst: (0, 0)),     # W1 (src half)
            pl.BlockSpec((f, eta), lambda i, src, dst: (0, 0)),     # W1 (dst half)
            pl.BlockSpec((1, eta), lambda i, src, dst: (0, 0)),     # b1
            pl.BlockSpec((eta, eta), lambda i, src, dst: (0, 0)),   # W2
            pl.BlockSpec((1, eta), lambda i, src, dst: (0, 0)),     # b2
            pl.BlockSpec((eta, LANE), lambda i, src, dst: (0, 0)),  # W3 (padded)
        ],
        out_specs=pl.BlockSpec((tile_e, LANE), lambda i, src, dst: (i, 0)),
        scratch_shapes=[pltpu.VMEM((tile_e, f), jnp.bfloat16),
                        pltpu.VMEM((tile_e, f), jnp.bfloat16)],
    )
    return pl.pallas_call(
        kern,
        out_shape=jax.ShapeDtypeStruct((e_pad, LANE), jnp.bfloat16),
        grid_spec=grid_spec,
        compiler_params=pltpu.CompilerParams(
            dimension_semantics=("parallel",),
            vmem_limit_bytes=_maybe_vmem_limit(vmem_needed)),
        cost_estimate=pl.CostEstimate(
            flops=e_pad * (2 * f * eta * 2 + 2 * eta * eta + 2 * eta * LANE),
            transcendentals=2 * e_pad * eta,
            bytes_accessed=(2 * n * f
                            + 2 * (2 * f * eta + eta * eta + eta * LANE)
                            + 4 * 2 * eta
                            + 4 * 2 * e_pad          # int32 indices
                            + 2 * e_pad * LANE)),    # bf16 out slab
    )(edges_src_pad, edges_dst_pad, h, w1s, w1d, b1, w2, b2, w3_pad)


# ----------------------------- model wrapper -------------------------------

def build_normalized_adjacency(edges_src, edges_dst, num_nodes):
    """Dense A_norm = D_in^{-1/2} A D_out^{-1/2}  (DGL GraphConv norm='both')."""
    a = jnp.zeros((num_nodes, num_nodes), jnp.float32)
    a = a.at[edges_dst, edges_src].add(1.0)       # message src -> dst
    deg_out = jnp.clip(a.sum(axis=0), 1.0, None)  # out-degree of src
    deg_in = jnp.clip(a.sum(axis=1), 1.0, None)   # in-degree of dst
    return a * jax.lax.rsqrt(deg_in)[:, None] * jax.lax.rsqrt(deg_out)[None, :]


def prepare_padded_params(params, in_feats, gamma, eta):
    """Zero-pad feature dims to multiples of 128, cast matmul operands to bf16.

    Padded weight ROWS are zero so sigmoid(0)=0.5 contamination in padded
    columns never reaches a real output column.
    """
    g_pad = _round_up(gamma, LANE)
    e_pad = _round_up(eta, LANE)
    w3_pad = jnp.zeros((e_pad, LANE), jnp.float32)
    w3_pad = w3_pad.at[:eta, :1].set(params["w3"])
    return {
        "w_conv1": _pad2d(params["w_conv1"], in_feats, g_pad, jnp.bfloat16),
        "b_conv1": _pad2d(params["b_conv1"], 1, g_pad, jnp.float32),
        "w_conv2": _pad2d(params["w_conv2"], g_pad, g_pad, jnp.bfloat16),
        "b_conv2": _pad2d(params["b_conv2"], 1, g_pad, jnp.float32),
        "w1_src": _pad2d(params["w1_src"], g_pad, e_pad, jnp.bfloat16),
        "w1_dst": _pad2d(params["w1_dst"], g_pad, e_pad, jnp.bfloat16),
        "b1": _pad2d(params["b1"], 1, e_pad, jnp.float32),
        "w2": _pad2d(params["w2"], e_pad, e_pad, jnp.bfloat16),
        "b2": _pad2d(params["b2"], 1, e_pad, jnp.float32),
        "w3": w3_pad.astype(jnp.bfloat16),
    }


def gcn_forward(a_norm, x, params, edges_src, edges_dst,
                *, tile_n=256, tile_e=128):
    num_nodes, _ = x.shape
    num_edges = edges_src.shape[0]

    # Keep >= 2 row tiles when possible so both v7x TensorCores stay busy;
    # never let the tile exceed the (128-aligned) padded node count.
    tile_n = min(tile_n, _round_up(num_nodes, LANE))
    n_pad = _round_up(num_nodes, tile_n)

    # pad + cast inputs.  A_norm is the dominant HBM stream -> bf16.
    # (f32-A option exists for production accuracy at 2x the HBM bytes.)
    a_p = _pad2d(a_norm, n_pad, n_pad, jnp.bfloat16)
    x_p = _pad2d(x, n_pad, x.shape[1], jnp.bfloat16)  # keep true in_feats width

    # conv1: H1 = relu(A @ (X W1) + b1)   -- single fused pallas_call
    h = graph_conv(a_p, x_p, params["w_conv1"], params["b_conv1"],
                   apply_relu=True, tile_m=tile_n, tile_k=tile_n)
    # conv2: H2 = A @ (H1 W2) + b2        -- single fused pallas_call
    h = graph_conv(a_p, h, params["w_conv2"], params["b_conv2"],
                   apply_relu=False, tile_m=tile_n, tile_k=tile_n)

    # fused edge gather + MLP (indices scalar-prefetched to SMEM; padded edge
    # slots point at row 0 and are sliced off below).
    e_pad = _round_up(num_edges, tile_e)
    src_p = jnp.zeros((e_pad,), jnp.int32).at[:num_edges].set(
        edges_src.astype(jnp.int32))
    dst_p = jnp.zeros((e_pad,), jnp.int32).at[:num_edges].set(
        edges_dst.astype(jnp.int32))

    out_slab = edge_mlp(h, src_p, dst_p,
                        params["w1_src"], params["w1_dst"], params["b1"],
                        params["w2"], params["b2"], params["w3"],
                        tile_e=tile_e)
    return out_slab[:num_edges, :1].astype(jnp.float32)


def init_params(key, in_feats, gamma, eta):
    ks = jax.random.split(key, 8)
    scale = 0.1
    w_conv1 = scale * jax.random.normal(ks[0], (in_feats, gamma), jnp.float32)
    b_conv1 = scale * jax.random.normal(ks[1], (1, gamma), jnp.float32)
    w_conv2 = scale * jax.random.normal(ks[2], (gamma, gamma), jnp.float32)
    b_conv2 = scale * jax.random.normal(ks[3], (1, gamma), jnp.float32)
    # nn.Linear weights are (out, in) in torch; store transposed (in, out) here.
    w1_t = scale * jax.random.normal(ks[4], (2 * gamma, eta), jnp.float32)
    b1 = scale * jax.random.normal(ks[5], (1, eta), jnp.float32)
    w2_t = scale * jax.random.normal(ks[6], (eta, eta), jnp.float32)
    b2 = scale * jax.random.normal(ks[7], (1, eta), jnp.float32)
    w3_t = scale * jax.random.normal(jax.random.fold_in(key, 99), (eta, 1),
                                     jnp.float32)
    return {
        "w_conv1": w_conv1, "b_conv1": b_conv1,
        "w_conv2": w_conv2, "b_conv2": b_conv2,
        "w1_src": w1_t[:gamma], "w1_dst": w1_t[gamma:], "b1": b1,
        "w2": w2_t, "b2": b2,
        "w3": w3_t,
    }


if __name__ == "__main__":
    key = jax.random.PRNGKey(0)
    k_feat, k_src, k_dst, k_par = jax.random.split(key, 4)

    # small synthetic graph (416 nodes as in the reference dataset)
    num_nodes = 416
    num_edges = 300
    in_feats = 16
    n = 18
    gamma = int(2 * n)   # 36 (GraphConv hidden)
    eta = int(2 * n)     # 36 (MLP hidden)

    x = jax.random.normal(k_feat, (num_nodes, in_feats), jnp.float32)
    edges_src = jax.random.randint(k_src, (num_edges,), 0, num_nodes)
    edges_dst = jax.random.randint(k_dst, (num_edges,), 0, num_nodes)

    a_norm = build_normalized_adjacency(edges_src, edges_dst, num_nodes)
    params = init_params(k_par, in_feats, gamma, eta)
    padded = prepare_padded_params(params, in_feats, gamma, eta)

    out = gcn_forward(a_norm, x, padded, edges_src, edges_dst)
    out = jax.block_until_ready(out)
    assert out.shape == (num_edges, 1)

    # reference check in plain JAX (full f32; kernels run bf16 matmul inputs
    # with f32 accumulation and a bf16 output slab, so compare loosely).
    h_ref = jnp.maximum(a_norm @ (x @ params["w_conv1"]) + params["b_conv1"], 0.0)
    h_ref = a_norm @ (h_ref @ params["w_conv2"]) + params["b_conv2"]
    cat = jnp.concatenate([h_ref[edges_src], h_ref[edges_dst]], axis=1)
    w1_full = jnp.concatenate([params["w1_src"], params["w1_dst"]], axis=0)
    h1 = jax.nn.sigmoid(cat @ w1_full + params["b1"])
    h2 = jax.nn.sigmoid(h1 @ params["w2"] + params["b2"])
    ref = h2 @ params["w3"]
    assert jnp.allclose(out, ref, atol=2e-2, rtol=2e-2), (
        float(jnp.max(jnp.abs(out - ref))))

    print("KERNEL_OK")
</pallas_src>

<mosaic_0001>
module attributes {stable_mosaic.version = 11 : i64} {
  func.func @_graph_conv_kernel(%arg0: i32, %arg1: i32, %arg2: memref<256x256xbf16, #tpu.memory_space<vmem>>, %arg3: memref<512x16xbf16, #tpu.memory_space<vmem>>, %arg4: memref<16x128xbf16, #tpu.memory_space<vmem>>, %arg5: memref<1x128xf32, #tpu.memory_space<vmem>>, %arg6: memref<256x128xbf16, #tpu.memory_space<vmem>>, %arg7: memref<256x128xf32, #tpu.memory_space<vmem>>) attributes {dimension_semantics = [#tpu.dimension_semantics<parallel>, #tpu.dimension_semantics<arbitrary>], iteration_bounds = array<i64: 2, 2>, scalar_prefetch = 0 : i64, scratch_operands = 1 : i64, tpu.core_type = #tpu.core_type<tc>, window_params = [{transform_indices = @transform_0, window_bounds = array<i64: 256, 256>}, {pipeline_mode = #tpu.pipeline_mode<synchronous>, transform_indices = @transform_1, window_bounds = array<i64: 512, 16>}, {pipeline_mode = #tpu.pipeline_mode<synchronous>, transform_indices = @transform_2, window_bounds = array<i64: 16, 128>}, {pipeline_mode = #tpu.pipeline_mode<synchronous>, transform_indices = @transform_3, window_bounds = array<i64: 1, 128>}, {transform_indices = @transform_4, window_bounds = array<i64: 256, 128>}]} {
    %c0_i32 = arith.constant 0 : i32
    %0 = arith.cmpi eq, %arg1, %c0_i32 : i32
    %1 = arith.extui %0 : i1 to i32
    %c0_i32_0 = arith.constant 0 : i32
    %2 = arith.cmpi ne, %1, %c0_i32_0 : i32
    scf.if %2 {
      %cst_11 = arith.constant 0.000000e+00 : f32
      %18 = vector.broadcast %cst_11 : f32 to vector<256x128xf32>
      %c0_12 = arith.constant 0 : index
      %c0_13 = arith.constant 0 : index
      %19 = vector.load %arg7[%c0_12, %c0_13] : memref<256x128xf32, #tpu.memory_space<vmem>>, vector<256x128xf32>
      tpu.vector_store %arg7[%c0_12, %c0_13], %18 {strides = array<i32>} : memref<256x128xf32, #tpu.memory_space<vmem>>, vector<256x128xf32>,
    } else {
    }
    %c256_i32 = arith.constant 256 : i32
    %3 = arith.muli %arg1, %c256_i32 : i32
    %4 = tpu.assume_multiple %3, 256 : i32
    %5 = arith.index_cast %4 : i32 to index
    %c0 = arith.constant 0 : index
    %6 = vector.load %arg3[%5, %c0] : memref<512x16xbf16, #tpu.memory_space<vmem>>, vector<256x16xbf16>
    %c0_1 = arith.constant 0 : index
    %c0_2 = arith.constant 0 : index
    %7 = vector.load %arg4[%c0_1, %c0_2] : memref<16x128xbf16, #tpu.memory_space<vmem>>, vector<16x128xbf16>
    %cst = arith.constant dense<0.000000e+00> : vector<256x128xf32>
    %8 = tpu.matmul %6, %7, %cst {dimension_numbers = #tpu.dot_dimension_numbers<[1], [0], [0], [1], [0, 0, 1, 1], [], []>} : vector<256x16xbf16>, vector<16x128xbf16>, vector<256x128xf32> -> vector<256x128xf32>
    %c0_3 = arith.constant 0 : index
    %c0_4 = arith.constant 0 : index
    %9 = vector.load %arg7[%c0_3, %c0_4] : memref<256x128xf32, #tpu.memory_space<vmem>>, vector<256x128xf32>
    %c0_5 = arith.constant 0 : index
    %c0_6 = arith.constant 0 : index
    %10 = vector.load %arg2[%c0_5, %c0_6] : memref<256x256xbf16, #tpu.memory_space<vmem>>, vector<256x256xbf16>
    %11 = arith.truncf %8 : vector<256x128xf32> to vector<256x128xbf16>
    %cst_7 = arith.constant dense<0.000000e+00> : vector<256x128xf32>
    %12 = tpu.matmul %10, %11, %cst_7 {dimension_numbers = #tpu.dot_dimension_numbers<[1], [0], [0], [1], [0, 0, 1, 1], [], []>} : vector<256x256xbf16>, vector<256x128xbf16>, vector<256x128xf32> -> vector<256x128xf32>
    %13 = arith.addf %9, %12 : vector<256x128xf32>
    %c0_8 = arith.constant 0 : index
    %c0_9 = arith.constant 0 : index
    %14 = vector.load %arg7[%c0_8, %c0_9] : memref<256x128xf32, #tpu.memory_space<vmem>>, vector<256x128xf32>
    tpu.vector_store %arg7[%c0_8, %c0_9], %13 {strides = array<i32>} : memref<256x128xf32, #tpu.memory_space<vmem>>, vector<256x128xf32>,
    %c1_i32 = arith.constant 1 : i32
    %15 = arith.cmpi eq, %arg1, %c1_i32 : i32
    %16 = arith.extui %15 : i1 to i32
    %c0_i32_10 = arith.constant 0 : i32
    %17 = arith.cmpi ne, %16, %c0_i32_10 : i32
    scf.if %17 {
      %c0_11 = arith.constant 0 : index
      %c0_12 = arith.constant 0 : index
      %18 = vector.load %arg7[%c0_11, %c0_12] : memref<256x128xf32, #tpu.memory_space<vmem>>, vector<256x128xf32>
      %c0_13 = arith.constant 0 : index
      %c0_14 = arith.constant 0 : index
      %19 = vector.load %arg5[%c0_13, %c0_14] : memref<1x128xf32, #tpu.memory_space<vmem>>, vector<1x128xf32>
      %20 = vector.broadcast %19 : vector<1x128xf32> to vector<256x128xf32>
      %21 = arith.addf %18, %20 : vector<256x128xf32>
      %cst_15 = arith.constant 0.000000e+00 : f32
      %22 = vector.broadcast %cst_15 : f32 to vector<256x128xf32>
      %23 = arith.maximumf %21, %22 : vector<256x128xf32>
      %24 = arith.truncf %23 : vector<256x128xf32> to vector<256x128xbf16>
      %c0_16 = arith.constant 0 : index
      %c0_17 = arith.constant 0 : index
      %25 = vector.load %arg6[%c0_16, %c0_17] : memref<256x128xbf16, #tpu.memory_space<vmem>>, vector<256x128xbf16>
      tpu.vector_store %arg6[%c0_16, %c0_17], %24 {strides = array<i32>} : memref<256x128xbf16, #tpu.memory_space<vmem>>, vector<256x128xbf16>,
    } else {
    }
    return
  }
  func.func @transform_0(%arg0: i32, %arg1: i32) -> (i32, i32) {
    %c0_i32 = arith.constant 0 : i32
    return %arg0, %arg1 : i32, i32
  }
  func.func @transform_1(%arg0: i32, %arg1: i32) -> (i32, i32) {
    %c0_i32 = arith.constant 0 : i32
    %c0_i32_0 = arith.constant 0 : i32
    %c0_i32_1 = arith.constant 0 : i32
    return %c0_i32, %c0_i32_0 : i32, i32
  }
  func.func @transform_2(%arg0: i32, %arg1: i32) -> (i32, i32) {
    %c0_i32 = arith.constant 0 : i32
    %c0_i32_0 = arith.constant 0 : i32
    %c0_i32_1 = arith.constant 0 : i32
    return %c0_i32, %c0_i32_0 : i32, i32
  }
  func.func @transform_3(%arg0: i32, %arg1: i32) -> (i32, i32) {
    %c0_i32 = arith.constant 0 : i32
    %c0_i32_0 = arith.constant 0 : i32
    %c0_i32_1 = arith.constant 0 : i32
    return %c0_i32, %c0_i32_0 : i32, i32
  }
  func.func @transform_4(%arg0: i32, %arg1: i32) -> (i32, i32) {
    %c0_i32 = arith.constant 0 : i32
    %c0_i32_0 = arith.constant 0 : i32
    return %arg0, %c0_i32 : i32, i32
  }
}

</mosaic_0001>

<bundles_post_ra>
// kernel: tpu_custom_call.1
= control target key start
LH: loop header
LB: loop body
LE: loop exit
PB: predicated region body
PF: predicated region fallthrough
CT: control target
= control target key end

     0   :  { %9 = vsyncpa [#allocation4], 0  ;;  %s2342_s0 = inlined_call_operand.hbm [shape: bf16[512,512], index: 0, kind: input, shape index: {}]   ;;  %s2343_s1 = inlined_call_operand.vmem [shape: bf16[512,16], index: 1, kind: input, shape index: {}]   ;;  %s2344_s2 = inlined_call_operand.vmem [shape: bf16[16,128], index: 2, kind: input, shape index: {}]   ;;  %s2345_s3 = inlined_call_operand.vmem [shape: f32[1,128], index: 3, kind: input, shape index: {}]   ;;  %s2346_s4 = inlined_call_operand.hbm [shape: bf16[512,128], index: 4, kind: output, shape index: {}]  }
   0x1   :  { %11 = vsyncpa [#allocation4 + $0x1], 0 }
   0x2   :  { %12 = vsyncpa [#allocation5], 0 }
   0x3   :  { %14 = vsyncpa [#allocation5 + $0x1], 0  ;;  %s1983_s15 = smov 0   ;;  %s1985_s16 = smov 0  }
   0x4   :  { %s1987_s17 = smov 0   ;;  %s1989_s18 = smov 0  }
   0x5   :  { %s1991_s19 = smov 0   ;;  %s1993_s20 = smov 0  }
   0x6   :  { %s1995_s21 = smov 0   ;;  %s1997_s22 = smov 0  }
   0x7   :  { %s1999_s23 = smov 0   ;;  %s2001_s24 = smov 0  }
   0x8   :  { %s2003_s25 = smov 0  }
   0x9 LB: > { %2353 = sst [smem:[#allocation9_spill]] %s1918_s17  ;;  %s1293_s26 = sadd.s32 4294967295, %s1950_s25   ;;  %s1950_s25 = sphi %s2003_s25, %s20_s25   ;;  %s1946_s24 = sphi %s2001_s24, %s2378_s24   ;;  %s1942_s23 = sphi %s1999_s23, %s2371_s23   ;;  %s1938_s22 = sphi %s1997_s22, %s2377_s22   ;;  %s1934_s21 = sphi %s1995_s21, %s2370_s21   ;;  %s1930_s20 = sphi %s1993_s20, %s2369_s20   ;;  %s1926_s19 = sphi %s1991_s19, %s2376_s19   ;;  %s1922_s18 = sphi %s1989_s18, %s2375_s18   ;;  %s1918_s17 = sphi %s1987_s17, %s2367_s17   ;;  %s1914_s16 = sphi %s1985_s16, %s2374_s16   ;;  %s1910_s15 = sphi %s1983_s15, %s2373_s15  }
   0xa   : > { %2354 = sst [smem:[#allocation10_spill]] %s1930_s20  ;;  %s1294_s27 = sadd.s32 4294967294, %s1950_s25  }
   0xb   : > { %2355 = sst [smem:[#allocation11_spill]] %s1942_s23  ;;  %s29_s28 = sadd.s32 1, %s1942_s23 }
   0xc   : > { %s32_s29 = sadd.s32 1, %s1946_s24  ;;  %p30_p0 = scmp.ge.s32.totalorder %s29_s28, 2 }
   0xd   : > { %s41_s30 = sadd.s32 1, %s1930_s20  ;;  %p48_p1 = scmp.ne.s32.totalorder %s1930_s20, %s1926_s19 }
   0xe   : > { %p49_p2 = scmp.eq.s32.totalorder %s1950_s25, 0  ;;  %s2380_s28 = smov (%p30_p0, %s29_s28), 0 }
   0xf   : > { %2356 = sst [smem:[#allocation12_spill]] %s2380_s28  ;;  %s2382_s29 = smov (!%p30_p0, %s32_s29), %s1946_s24 }
  0x10   : > { %s37_s5 = ssub.s32 %s1942_s23, %s2380_s28  ;;  %p2049_p3 = por %p49_p2, %p48_p1 }
  0x11   : > { %p34_p4 = scmp.ge.s32.totalorder %s2382_s29, 2  ;;  %p54_p5 = scmp.ne.s32.totalorder %s1926_s19, %s1922_s18 }
  0x12   : > { %p55_p6 = scmp.eq.s32.totalorder %s1293_s26, 0  ;;  %s130_s7 = sadd.s32 1, %s1918_s17 }
  0x13   : > { %s2384_s29 = smov (%p34_p4, %s2382_s29), 0  ;;  %p140_p8 = scmp.ne.s32.totalorder %s1918_s17, %s1914_s16 }
  0x14   : > { %2358 = sst [smem:[#allocation13_spill]] %s2384_s29  ;;  %p2057_p7 = por %p55_p6, %p54_p5 }
  0x15   : > { %s36_s9 = ssub.s32 %s1946_s24, %s2384_s29  ;;  %p141_p9 = scmp.eq.s32.totalorder %s1293_s26, 3 }
  0x16   : > { %s38_s10 = sor.u32 %s37_s5, %s36_s9  ;;  %p128_p10 = scmp.eq.s32.totalorder %s36_s9, 0 }
  0x17   : > { %p39_p11 = scmp.eq.s32.totalorder %s38_s10, 0  ;;  %p2065_p12 = por %p141_p9, %p140_p8 }
  0x18   : > { %s2070_s12 = scalar_select %p128_p10, %s1918_s17, %s130_s7  }
  0x19   : > { %s2073_s13 = scalar_select %p39_p11, %s1930_s20, %s41_s30  }
  0x1a   : > { %2361 = sst [smem:[#allocation14_spill]] %s2070_s12  ;;  %p146_p13 = scmp.ne.s32.totalorder %s1914_s16, %s1910_s15 }
  0x1b   : > { %2362 = sst [smem:[#allocation15_spill]] %s2073_s13  ;;  %p147_p0 = scmp.eq.s32.totalorder %s1294_s27, 3 }
  0x1c   : > { %p1701_p1 = scmp.lt.s32.totalorder %s1950_s25, 4  ;;  %s176_s18 = sand.u32 1, %s1930_s20  }
  0x1d   : > { %p2078_p2 = por %p147_p0, %p146_p13  ;;  %s1297_s26 = sshll.u32 %s176_s18, 8 }
  0x1e   : > { %s1299_s5 = sshll.u32 %s1942_s23, 1  ;;  %s1526_s9 = sshll.u32 %s1946_s24, 7 }
  0x1f   : > { %s2363_s14 = scalar_select %p2078_p2, 1, 0 }
  0x20   : > { %s180_s10 = scalar_lea.vmem [#allocation3], %s1297_s26  ;;  %s186_s28 = sadd.s32 %s1526_s9, %s1299_s5 }
  0x21   : > { %2364 = sst [smem:[#allocation16_spill]] %s2363_s14  ;;  %s191_s29 = sshll.u32 %s180_s10, 4  ;;  %s192_s29 = int_to_ptr.vmem [resolvable:$true] %s191_s29 }
  0x22   : > { %s1301_s7 = sshll.u32 %s186_s28, 2  ;;  %p1694_p4 = pnand %p1701_p1, %p2049_p3 }
  0x23   : > { %s188_s13 = scalar_lea.hbm %s2342_s0, %s1301_s7  ;;  %p1302_p5 = scmp.ge.s32.totalorder %s1950_s25, 1 }
  0x24   : > { %s189_s12 = sshll.u32 %s188_s13, 4  ;;  %s177_s17 = scalar_lea.sflag [#allocation4], %s176_s18  ;;  %s190_s12 = int_to_ptr.hbm [resolvable:$true] %s189_s12 }
  0x25   : > { %s1952_s20 = smov 256   ;;  %s1953_s14 = smov 128  }
  0x26   : > { %s1954_s23 = smov 8   ;;  %p199_p6 = scmp.lt.s32.totalorder %s1950_s25, 5 }
  0x27   : > { %1696 = dma.hbm_to_vmem [thread:$0]  (!%p1694_p4), %s190_s12, 4096, %s192_s29, %s177_s17, %s1952_s20, %s1953_s14, %s1954_s23  }
  0x28   : > { %p200_p8 = pnand %p1302_p5, %p199_p6 }
  0x29   : > { %s205_s28 = sand.u32 (!%p200_p8), 1, %s1926_s19  }
  0x2a   : > { %203 = sbr.rel (%p200_p8) target bundleno = 803 (0x323), region = 36  ;;  %s1303_s6 = sshll.u32 (!%p200_p8), %s205_s28, 8 }
  0x2b   : > { %s206_s26 = scalar_lea.sflag (!%p200_p8), [#allocation4], %s205_s28  ;;  %s2093_s5 = scalar_lea.vmem (!%p200_p8), [#allocation3], %s1303_s6 }
  0x2f   : > { %1901 = dma.done.wait (%p2057_p7), %s206_s26, 4096  }
  0x30   : > { %1903 = vsyncadd (%p2057_p7), %s206_s26, 4294963200  ;;  %s232_s13 = sand.u32 1, %s1914_s16   ;;  %p1305_p3 = scmp.ne.s32.totalorder %s1934_s21, 0 }
  0x31   : > { %s1304_s17 = sshll.u32 %s232_s13, 7 }
  0x32   : > { %s2102_s20 = scalar_lea.vmem [#allocation6], %s1304_s17  ;;  %242 = sbr.rel (%p1305_p3) target bundleno = 88 (0x58), region = 44 }
  0x37   : > { %v1955_v0 = vmov 0.0  }
  0x38   : > { %243 = vst [vmem:[#allocation2 + $0xb0] sm:$0xff] %v1955_v0 }
  0x39   : > { %244 = vst [vmem:[#allocation2] sm:$0xff] %v1955_v0 }
  0x3a   : > { %245 = vst [vmem:[#allocation2 + $0xd8] sm:$0xff] %v1955_v0 }
  0x3b   : > { %246 = vst [vmem:[#allocation2 + $0x18] sm:$0xff] %v1955_v0 }
  0x3c   : > { %247 = vst [vmem:[#allocation2 + $0x50] sm:$0xff] %v1955_v0 }
  0x3d   : > { %248 = vst [vmem:[#allocation2 + $0x68] sm:$0xff] %v1955_v0 }
  0x3e   : > { %249 = vst [vmem:[#allocation2 + $0x30] sm:$0xff] %v1955_v0 }
  0x3f   : > { %250 = vst [vmem:[#allocation2 + $0x48] sm:$0xff] %v1955_v0 }
  0x40   : > { %251 = vst [vmem:[#allocation2 + $0x80] sm:$0xff] %v1955_v0 }
  0x41   : > { %252 = vst [vmem:[#allocation2 + $0x88] sm:$0xff] %v1955_v0 }
  0x42   : > { %253 = vst [vmem:[#allocation2 + $0xe8] sm:$0xff] %v1955_v0 }
  0x43   : > { %254 = vst [vmem:[#allocation2 + $0xb8] sm:$0xff] %v1955_v0 }
  0x44   : > { %255 = vst [vmem:[#allocation2 + $0x60] sm:$0xff] %v1955_v0 }
  0x45   : > { %256 = vst [vmem:[#allocation2 + $0xf0] sm:$0xff] %v1955_v0 }
  0x46   : > { %257 = vst [vmem:[#allocation2 + $0x8] sm:$0xff] %v1955_v0 }
  0x47   : > { %258 = vst [vmem:[#allocation2 + $0x78] sm:$0xff] %v1955_v0 }
  0x48   : > { %259 = vst [vmem:[#allocation2 + $0x38] sm:$0xff] %v1955_v0 }
  0x49   : > { %260 = vst [vmem:[#allocation2 + $0x58] sm:$0xff] %v1955_v0 }
  0x4a   : > { %261 = vst [vmem:[#allocation2 + $0x40] sm:$0xff] %v1955_v0 }
  0x4b   : > { %262 = vst [vmem:[#allocation2 + $0xc8] sm:$0xff] %v1955_v0 }
  0x4c   : > { %263 = vst [vmem:[#allocation2 + $0xe0] sm:$0xff] %v1955_v0 }
  0x4d   : > { %264 = vst [vmem:[#allocation2 + $0x90] sm:$0xff] %v1955_v0 }
  0x4e   : > { %265 = vst [vmem:[#allocation2 + $0x70] sm:$0xff] %v1955_v0 }
  0x4f   : > { %266 = vst [vmem:[#allocation2 + $0xc0] sm:$0xff] %v1955_v0 }
  0x50   : > { %267 = vst [vmem:[#allocation2 + $0xa8] sm:$0xff] %v1955_v0 }
  0x51   : > { %268 = vst [vmem:[#allocation2 + $0xd0] sm:$0xff] %v1955_v0 }
  0x52   : > { %269 = vst [vmem:[#allocation2 + $0x10] sm:$0xff] %v1955_v0 }
  0x53   : > { %270 = vst [vmem:[#allocation2 + $0x28] sm:$0xff] %v1955_v0 }
  0x54   : > { %271 = vst [vmem:[#allocation2 + $0xa0] sm:$0xff] %v1955_v0 }
  0x55   : > { %272 = vst [vmem:[#allocation2 + $0xf8] sm:$0xff] %v1955_v0 }
  0x56   : > { %273 = vst [vmem:[#allocation2 + $0x20] sm:$0xff] %v1955_v0 }
  0x57   : > { %274 = vst [vmem:[#allocation2 + $0x98] sm:$0xff] %v1955_v0 }
  0x58 PF: > { %v1543_v1 = vld [vmem:[%s2344_s2] sm:$0xff]  ;;  %s1306_s8 = sshll.u32 %s1934_s21, 8  ;;  %vm400_vm0 = vcmask 130048   ;;  %v1569_v60 = vld [vmem:[%s2093_s5 + $0xc4] sm:$0xf0]  ;;  %p1520_p7 = scmp.ne.s32.totalorder %s1934_s21, 1 }
  0x59   : > { %s276_s12 = sshra.s32 %s1306_s8, 3  ;;  %456 = vmatpush.bf16.msra.mxu0 %v1543_v1  ;;  %1672 = vmatpush.bf16.msra.mxu3 %v1543_v1  ;;  %v1490_v59 = vld [vmem:[%s2093_s5 + $0xc0] sm:$0xf]  ;;  %v1545_v0 = vld [vmem:[%s2093_s5 + $0x4] sm:$0xf0] }
  0x5a   : > { %s1307_s14 = sshll.u32 %s276_s12, 2  ;;  %v1491_v61 = vor.u32 %v1569_v60, %v1490_v59  ;;  %v1394_v63 = vld [vmem:[%s2093_s5] sm:$0xf]  ;;  %v1574_v59 = vld [vmem:[%s2093_s5 + $0xf4] sm:$0xf] }
  0x5b   : > { %s2112_s10 = scalar_lea.vmem %s2343_s1, %s1307_s14  ;;  %v1395_v1 = vor.u32 %v1545_v0, %v1394_v63  ;;  %v1516_v60 = vld [vmem:[%s2093_s5 + $0xf8] sm:$0xf0]  ;;  %v1559_v63 = vld [vmem:[%s2093_s5 + $0x74] sm:$0xf0]  ;;  %v1554_v0 = vld [vmem:[%s2093_s5 + $0x54] sm:$0xf] }
  0x5c   : > { %v1527_v2 = vld [vmem:[%s2112_s10] sm:$0xff]  ;;  %v1528_v3 = vld [vmem:[%s2112_s10 + $0x8] sm:$0xff]  ;;  %v1529_v4 = vld [vmem:[%s2112_s10 + $0x10] sm:$0xff] }
  0x5d   : > { %1376 = vmatmul.msk.bf16.vlgmr.msra.gmra.mxu0 %vm400_vm0, %v1527_v2  ;;  %v1530_v5 = vld [vmem:[%s2112_s10 + $0x18] sm:$0xff]  ;;  %v1540_v6 = vld [vmem:[%s2112_s10 + $0x68] sm:$0xff]  ;;  %v1531_v7 = vld [vmem:[%s2112_s10 + $0x20] sm:$0xff] }
  0x5e   : > { %1389 = vmatmul.msk.bf16.vlgmr.msra.gmra.mxu3 %vm400_vm0, %v1540_v6  ;;  %v1541_v8 = vld [vmem:[%s2112_s10 + $0x70] sm:$0xff]  ;;  %v1532_v9 = vld [vmem:[%s2112_s10 + $0x28] sm:$0xff]  ;;  %v1542_v11 = vld [vmem:[%s2112_s10 + $0x78] sm:$0xff] }
  0x5f   : > { %v1533_v10 = vld [vmem:[%s2112_s10 + $0x30] sm:$0xff]  ;;  %v1534_v12 = vld [vmem:[%s2112_s10 + $0x38] sm:$0xff]  ;;  %v1535_v13 = vld [vmem:[%s2112_s10 + $0x40] sm:$0xff] }
  0x60   : > { %v1536_v17 = vld [vmem:[%s2112_s10 + $0x48] sm:$0xff]  ;;  %v1537_v21 = vld [vmem:[%s2112_s10 + $0x50] sm:$0xff]  ;;  %v1538_v25 = vld [vmem:[%s2112_s10 + $0x58] sm:$0xff] }
  0x61   : > { %v1539_v29 = vld [vmem:[%s2112_s10 + $0x60] sm:$0xff]  ;;  %v1498_v2 = vld [vmem:[%s2093_s5 + $0xd0] sm:$0xf] }
  0x62   : > { %v1402_v6 = vld [vmem:[%s2093_s5 + $0x10] sm:$0xf] }
  0x6d   : > { %1377 = vmatmul.msk.bf16.gmra.mxu0 %vm400_vm0, %v1528_v3  ;;  %v1571_v3 = vld [vmem:[%s2093_s5 + $0xd4] sm:$0xf0] }
  0x6e   : > { %1390 = vmatmul.msk.bf16.gmra.mxu3 %vm400_vm0, %v1541_v8 }
  0x7d   : > { %1378 = vmatmul.msk.bf16.gmra.mxu0 %vm400_vm0, %v1529_v4 }
  0x7e   : > { %1391 = vmatmul.msk.bf16.gmra.mxu3 %vm400_vm0, %v1542_v11 }
  0x8d   : > { %1379 = vmatmul.msk.bf16.gmra.mxu0 %vm400_vm0, %v1530_v5  ;;  %v1499_v5 = vor.u32 %v1571_v3, %v1498_v2 }
  0x9d   : > { %1380 = vmatmul.msk.bf16.gmra.mxu0 %vm400_vm0, %v1531_v7  ;;  %v1547_v7 = vld [vmem:[%s2093_s5 + $0x14] sm:$0xf0] }
  0xad   : > { %1381 = vmatmul.msk.bf16.gmra.mxu0 %vm400_vm0, %v1532_v9  ;;  %v1403_v9 = vor.u32 %v1547_v7, %v1402_v6  ;;  %v1556_v6 = vld [vmem:[%s2093_s5 + $0x64] sm:$0xf]  ;;  %v1444_v7 = vld [vmem:[%s2093_s5 + $0x68] sm:$0xf0] }
  0xbd   : > { %1382 = vmatmul.msk.bf16.gmra.mxu0 %vm400_vm0, %v1533_v10 }
  0xcd   : > { %1383 = vmatmul.msk.bf16.gmra.mxu0 %vm400_vm0, %v1534_v12  ;;  %v1506_v12 = vld [vmem:[%s2093_s5 + $0xe0] sm:$0xf] }
  0xda   : > { %v458_v14 = vpop.f32.mrf.mxu0 }
  0xdd   : > { %1384 = vmatmul.msk.bf16.gmra.mxu0 %vm400_vm0, %v1535_v13  ;;  %v1573_v13 = vld [vmem:[%s2093_s5 + $0xe4] sm:$0xf0] }
  0xe1   : > { %v523_v31 = vpop.f32.mrf.mxu3 }
  0xe2   : > { %v460_v15 = vpop.f32.mrf.mxu0 }
  0xe3   : > { %v602_v16 = vpack.c.bf16 %v460_v15, %v458_v14  ;;  %v1507_v15 = vor.u32 %v1573_v13, %v1506_v12 }
  0xe9   : > { %v525_v33 = vpop.f32.mrf.mxu3 }
  0xea   : > { %v463_v18 = vpop.f32.mrf.mxu0  ;;  %v615_v45 = vpack.c.bf16 %v525_v33, %v523_v31  ;;  %v1492_v33 = vld [vmem:[%s2093_s5 + $0xc8] sm:$0xf0] }
  0xed   : > { %1385 = vmatmul.msk.bf16.gmra.mxu0 %vm400_vm0, %v1536_v17  ;;  %v1410_v17 = vld [vmem:[%s2093_s5 + $0x20] sm:$0xf] }
  0xf1   : > { %v528_v35 = vpop.f32.mrf.mxu3 }
  0xf2   : > { %v465_v19 = vpop.f32.mrf.mxu0 }
  0xf3   : > { %v603_v20 = vpack.c.bf16 %v465_v19, %v463_v18  ;;  %v1549_v18 = vld [vmem:[%s2093_s5 + $0x24] sm:$0xf0]  ;;  %v1544_v19 = vld [vmem:[%s2093_s5 + $0x4] sm:$0xf] }
  0xf9   : > { %v530_v37 = vpop.f32.mrf.mxu3 }
  0xfa   : > { %v468_v22 = vpop.f32.mrf.mxu0  ;;  %v616_v43 = vpack.c.bf16 %v530_v37, %v528_v35  ;;  %v1426_v35 = vld [vmem:[%s2093_s5 + $0x40] sm:$0xf]  ;;  %v1548_v37 = vld [vmem:[%s2093_s5 + $0x24] sm:$0xf] }
  0xfd   : > { %1386 = vmatmul.msk.bf16.gmra.mxu0 %vm400_vm0, %v1537_v21  ;;  %v1411_v21 = vor.u32 %v1549_v18, %v1410_v17  ;;  %v1466_v18 = vld [vmem:[%s2093_s5 + $0x90] sm:$0xf] }
 0x101   : > { %v533_v39 = vpop.f32.mrf.mxu3 }
 0x102   : > { %v470_v23 = vpop.f32.mrf.mxu0 }
 0x103   : > { %v604_v24 = vpack.c.bf16 %v470_v23, %v468_v22  ;;  %v1514_v23 = vld [vmem:[%s2093_s5 + $0xf0] sm:$0xf] }
 0x109   : > { %v535_v41 = vpop.f32.mrf.mxu3 }
 0x10a   : > { %v473_v26 = vpop.f32.mrf.mxu0  ;;  %v617_v42 = vpack.c.bf16 %v535_v41, %v533_v39  ;;  %v1570_v41 = vld [vmem:[%s2093_s5 + $0xd4] sm:$0xf] }
 0x10c   : > { %867 = vmatpush.bf16.msra.mxu2 %v617_v42 }
 0x10d   : > { %1387 = vmatmul.msk.bf16.gmra.mxu0 %vm400_vm0, %v1538_v25 }
 0x110   : > { %868 = vmatpush.bf16.msra.mxu2 %v616_v43 }
 0x112   : > { %v475_v27 = vpop.f32.mrf.mxu0 }
 0x113   : > { %v605_v28 = vpack.c.bf16 %v475_v27, %v473_v26  ;;  %v1418_v26 = vld [vmem:[%s2093_s5 + $0x30] sm:$0xf]  ;;  %v1551_v27 = vld [vmem:[%s2093_s5 + $0x34] sm:$0xf0] }
 0x114   : > { %869 = vmatpush.bf16.msra.mxu2 %v615_v45 }
 0x11a   : > { %v478_v30 = vpop.f32.mrf.mxu0 }
 0x11d   : > { %1388 = vmatmul.msk.bf16.gmra.mxu0 %vm400_vm0, %v1539_v29  ;;  %v1404_v29 = vld [vmem:[%s2093_s5 + $0x18] sm:$0xf0] }
 0x122   : > { %v480_v32 = vpop.f32.mrf.mxu0 }
 0x123   : > { %v606_v51 = vpack.c.bf16 %v480_v32, %v478_v30  ;;  %v1419_v30 = vor.u32 %v1551_v27, %v1418_v26  ;;  %v1568_v32 = vld [vmem:[%s2093_s5 + $0xc4] sm:$0xf]  ;;  %v1474_v27 = vld [vmem:[%s2093_s5 + $0xa0] sm:$0xf] }
 0x12a   : > { %v483_v34 = vpop.f32.mrf.mxu0 }
 0x132   : > { %v485_v36 = vpop.f32.mrf.mxu0 }
 0x133   : > { %v607_v50 = vpack.c.bf16 %v485_v36, %v483_v34  ;;  %v1495_v34 = vor.u32 %v1568_v32, %v1492_v33  ;;  %v1553_v36 = vld [vmem:[%s2093_s5 + $0x44] sm:$0xf0]  ;;  %v538_v32 = vld [vmem:[#allocation2 + $0xb0] sm:$0xff] }
 0x134   : > { %v1427_v39 = vor.u32 %v1553_v36, %v1426_v35 }
 0x13a   : > { %v488_v38 = vpop.f32.mrf.mxu0 }
 0x142   : > { %v490_v40 = vpop.f32.mrf.mxu0 }
 0x143   : > { %v608_v48 = vpack.c.bf16 %v490_v40, %v488_v38  ;;  %v1412_v38 = vld [vmem:[%s2093_s5 + $0x28] sm:$0xf0] }
 0x144   : > { %v1415_v40 = vor.u32 %v1548_v37, %v1412_v38  ;;  %v1562_v38 = vld [vmem:[%s2093_s5 + $0x94] sm:$0xf] }
 0x14a   : > { %v493_v44 = vpop.f32.mrf.mxu0 }
 0x152   : > { %v495_v46 = vpop.f32.mrf.mxu0 }
 0x153   : > { %v609_v47 = vpack.c.bf16 %v495_v46, %v493_v44  ;;  %v1434_v44 = vld [vmem:[%s2093_s5 + $0x50] sm:$0xf]  ;;  %v1550_v46 = vld [vmem:[%s2093_s5 + $0x34] sm:$0xf] }
 0x155   : > { %778 = vmatpush.bf16.msra.mxu1 %v609_v47  ;;  %1673 = vmatpush.bf16.msrb.mxu3 %v609_v47  ;;  %v1420_v47 = vld [vmem:[%s2093_s5 + $0x38] sm:$0xf0] }
 0x159   : > { %779 = vmatpush.bf16.msra.mxu1 %v608_v48  ;;  %1674 = vmatpush.bf16.msrb.mxu3 %v608_v48 }
 0x15a   : > { %v498_v49 = vpop.f32.mrf.mxu0 }
 0x15d   : > { %780 = vmatpush.bf16.msra.mxu1 %v607_v50  ;;  %1675 = vmatpush.bf16.msrb.mxu3 %v607_v50  ;;  %v1572_v50 = vld [vmem:[%s2093_s5 + $0xe4] sm:$0xf] }
 0x161   : > { %781 = vmatpush.bf16.msra.mxu1 %v606_v51  ;;  %1676 = vmatpush.bf16.msrb.mxu3 %v606_v51  ;;  %v1508_v51 = vld [vmem:[%s2093_s5 + $0xe8] sm:$0xf0] }
 0x162   : > { %v500_v52 = vpop.f32.mrf.mxu0 }
 0x163   : > { %v610_v53 = vpack.c.bf16 %v500_v52, %v498_v49  ;;  %v1423_v49 = vor.u32 %v1550_v46, %v1420_v47  ;;  %v1511_v52 = vor.u32 %v1572_v50, %v1508_v51  ;;  %v540_v50 = vld [vmem:[#allocation2 + $0xd8] sm:$0xff] }
 0x165   : > { %782 = vmatpush.bf16.msra.mxu1 %v605_v28  ;;  %1677 = vmatpush.bf16.msrb.mxu3 %v605_v28  ;;  %v1546_v28 = vld [vmem:[%s2093_s5 + $0x14] sm:$0xf] }
 0x166   : > { %v1407_v31 = vor.u32 %v1546_v28, %v1404_v29  ;;  %v1565_v28 = vld [vmem:[%s2093_s5 + $0xa4] sm:$0xf0] }
 0x169   : > { %783 = vmatpush.bf16.msra.mxu1 %v604_v24  ;;  %1678 = vmatpush.bf16.msrb.mxu3 %v604_v24  ;;  %v1575_v24 = vld [vmem:[%s2093_s5 + $0xf4] sm:$0xf0] }
 0x16a   : > { %v503_v54 = vpop.f32.mrf.mxu0  ;;  %v1515_v25 = vor.u32 %v1575_v24, %v1514_v23  ;;  %v1560_v24 = vld [vmem:[%s2093_s5 + $0x84] sm:$0xf] }
 0x16d   : > { %784 = vmatpush.bf16.msra.mxu1 %v603_v20  ;;  %1679 = vmatpush.bf16.msrb.mxu3 %v603_v20  ;;  %v1396_v20 = vld [vmem:[%s2093_s5 + $0x8] sm:$0xf0] }
 0x16e   : > { %v1399_v22 = vor.u32 %v1544_v19, %v1396_v20  ;;  %v1563_v19 = vld [vmem:[%s2093_s5 + $0x94] sm:$0xf0] }
 0x171   : > { %785 = vmatpush.bf16.msra.mxu1 %v602_v16  ;;  %1680 = vmatpush.bf16.msrb.mxu3 %v602_v16 }
 0x172   : > { %v505_v55 = vpop.f32.mrf.mxu0 }
 0x173   : > { %v611_v16 = vpack.c.bf16 %v505_v55, %v503_v54  ;;  %v1557_v54 = vld [vmem:[%s2093_s5 + $0x64] sm:$0xf0]  ;;  %v1552_v55 = vld [vmem:[%s2093_s5 + $0x44] sm:$0xf] }
 0x174   : > { %846 = vmatmul.bf16.vlgmr.msrb.gmra.mxu3 %v1491_v61  ;;  %786 = vmatmul.bf16.vlgmr.msra.gmra.mxu1 %v1395_v1  ;;  %v1519_v61 = vor.u32 %v1574_v59, %v1516_v60  ;;  %v1436_v1 = vld [vmem:[%s2093_s5 + $0x58] sm:$0xf0] }
 0x175   : > { %1681 = vmatpush.bf16.msra.mxu3 %v617_v42  ;;  %v1500_v42 = vld [vmem:[%s2093_s5 + $0xd8] sm:$0xf0]  ;;  %v1439_v3 = vor.u32 %v1554_v0, %v1436_v1  ;;  %v562_v0 = vld [vmem:[#allocation2 + $0xa8] sm:$0xff] }
 0x179   : > { %1682 = vmatpush.bf16.msra.mxu3 %v616_v43  ;;  %v1503_v43 = vor.u32 %v1570_v41, %v1500_v42  ;;  %v1482_v42 = vld [vmem:[%s2093_s5 + $0xb0] sm:$0xf] }
 0x17a   : > { %v508_v56 = vpop.f32.mrf.mxu0 }
 0x17d   : > { %1683 = vmatpush.bf16.msra.mxu3 %v615_v45  ;;  %v1555_v45 = vld [vmem:[%s2093_s5 + $0x54] sm:$0xf0] }
 0x17e   : > { %v1435_v48 = vor.u32 %v1555_v45, %v1434_v44 }
 0x182   : > { %v510_v57 = vpop.f32.mrf.mxu0 }
 0x183   : > { %v612_v14 = vpack.c.bf16 %v510_v57, %v508_v56  ;;  %v1428_v56 = vld [vmem:[%s2093_s5 + $0x48] sm:$0xf0] }
 0x184   : > { %851 = vmatmul.bf16.gmra.mxu3 %v1499_v5  ;;  %791 = vmatmul.bf16.gmra.mxu1 %v1403_v9  ;;  %v1561_v5 = vld [vmem:[%s2093_s5 + $0x84] sm:$0xf0] }
 0x18a   : > { %v513_v58 = vpop.f32.mrf.mxu0 }
 0x192   : > { %v515_v62 = vpop.f32.mrf.mxu0 }
 0x193   : > { %v613_v11 = vpack.c.bf16 %v515_v62, %v513_v58  ;;  %v1431_v58 = vor.u32 %v1552_v55, %v1428_v56  ;;  %v1450_v62 = vld [vmem:[%s2093_s5 + $0x70] sm:$0xf]  ;;  %v1564_v55 = vld [vmem:[%s2093_s5 + $0xa4] sm:$0xf]  ;;  %v1476_v56 = vld [vmem:[%s2093_s5 + $0xa8] sm:$0xf0] }
 0x194   : > { %856 = vmatmul.bf16.gmra.mxu3 %v1507_v15  ;;  %796 = vmatmul.bf16.gmra.mxu1 %v1411_v21  ;;  %v1451_v2 = vor.u32 %v1559_v63, %v1450_v62  ;;  %v1452_v15 = vld [vmem:[%s2093_s5 + $0x78] sm:$0xf0]  ;;  %v1467_v21 = vor.u32 %v1563_v19, %v1466_v18 }
 0x19a   : > { %v518_v4 = vpop.f32.mrf.mxu0 }
 0x1a2   : > { %v520_v8 = vpop.f32.mrf.mxu0 }
 0x1a3   : > { %v614_v10 = vpack.c.bf16 %v520_v8, %v518_v4  ;;  %v1458_v4 = vld [vmem:[%s2093_s5 + $0x80] sm:$0xf] }
 0x1a4   : > { %861 = vmatmul.bf16.gmra.mxu3 %v1515_v25  ;;  %801 = vmatmul.bf16.gmra.mxu1 %v1419_v30  ;;  %v1459_v8 = vor.u32 %v1561_v5, %v1458_v4  ;;  %v1460_v25 = vld [vmem:[%s2093_s5 + $0x88] sm:$0xf0]  ;;  %v1475_v30 = vor.u32 %v1565_v28, %v1474_v27 }
 0x1a5   : > { %870 = vmatpush.bf16.msra.mxu2 %v614_v10  ;;  %1684 = vmatpush.bf16.msra.mxu3 %v614_v10  ;;  %v1463_v29 = vor.u32 %v1560_v24, %v1460_v25  ;;  %v564_v24 = vld [vmem:[#allocation2 + $0x10] sm:$0xff] }
 0x1a9   : > { %871 = vmatpush.bf16.msra.mxu2 %v613_v11  ;;  %1685 = vmatpush.bf16.msra.mxu3 %v613_v11  ;;  %v1447_v11 = vor.u32 %v1556_v6, %v1444_v7 }
 0x1ad   : > { %872 = vmatpush.bf16.msra.mxu2 %v612_v14  ;;  %1686 = vmatpush.bf16.msra.mxu3 %v612_v14  ;;  %v1558_v14 = vld [vmem:[%s2093_s5 + $0x74] sm:$0xf] }
 0x1ae   : > { %v1455_v20 = vor.u32 %v1558_v14, %v1452_v15  ;;  %v1566_v14 = vld [vmem:[%s2093_s5 + $0xb4] sm:$0xf]  ;;  %v1484_v15 = vld [vmem:[%s2093_s5 + $0xb8] sm:$0xf0] }
 0x1b1   : > { %873 = vmatpush.bf16.msra.mxu2 %v611_v16  ;;  %1687 = vmatpush.bf16.msra.mxu3 %v611_v16 }
 0x1b4   : > { %806 = vmatmul.bf16.gmra.mxu1 %v1427_v39  ;;  %v1468_v39 = vld [vmem:[%s2093_s5 + $0x98] sm:$0xf0] }
 0x1b5   : > { %874 = vmatpush.bf16.msra.mxu2 %v610_v53  ;;  %1688 = vmatpush.bf16.msra.mxu3 %v610_v53  ;;  %v1442_v53 = vld [vmem:[%s2093_s5 + $0x60] sm:$0xf]  ;;  %v1471_v45 = vor.u32 %v1562_v38, %v1468_v39 }
 0x1b6   : > { %v1443_v57 = vor.u32 %v1557_v54, %v1442_v53 }
 0x1b8   : > { %875 = vmatmul.bf16.vlgmr.msra.gmra.mxu2 %v1399_v22  ;;  %935 = vmatmul.bf16.vlgmr.msra.gmra.mxu3 %v1495_v34 }
 0x1c4   : > { %811 = vmatmul.bf16.gmra.mxu1 %v1435_v48 }
 0x1c8   : > { %880 = vmatmul.bf16.gmra.mxu2 %v1407_v31  ;;  %940 = vmatmul.bf16.gmra.mxu3 %v1503_v43  ;;  %v1567_v43 = vld [vmem:[%s2093_s5 + $0xb4] sm:$0xf0] }
 0x1c9   : > { %v1483_v47 = vor.u32 %v1567_v43, %v1482_v42 }
 0x1d4   : > { %816 = vmatmul.bf16.gmra.mxu1 %v1443_v57  ;;  %v541_v57 = vld [vmem:[#allocation2 + $0x18] sm:$0xff] }
 0x1d8   : > { %885 = vmatmul.bf16.gmra.mxu2 %v1415_v40  ;;  %945 = vmatmul.bf16.gmra.mxu3 %v1511_v52  ;;  %v539_v40 = vld [vmem:[#allocation2] sm:$0xff] }
 0x1e4   : > { %821 = vmatmul.bf16.gmra.mxu1 %v1451_v2 }
 0x1e8   : > { %890 = vmatmul.bf16.gmra.mxu2 %v1423_v49  ;;  %950 = vmatmul.bf16.gmra.mxu3 %v1519_v61  ;;  %v1479_v61 = vor.u32 %v1564_v55, %v1476_v56 }
 0x1f1   : > { %v787_v9 = vpop.f32.mrf.mxu1 }
 0x1f4   : > { %826 = vmatmul.bf16.gmra.mxu1 %v1459_v8  ;;  %v563_v8 = vld [vmem:[#allocation2 + $0xd0] sm:$0xff] }
 0x1f7   : > { %v2194_v10 = vpop.f32.mrf.mxu3 }
 0x1f8   : > { %895 = vmatmul.bf16.gmra.mxu2 %v1431_v58 }
 0x1f9   : > { %v789_v12 = vpop.f32.mrf.mxu1 }
 0x1ff   : > { %v2196_v13 = vpop.f32.mrf.mxu3 }
 0x201   : > { %v792_v16 = vpop.f32.mrf.mxu1 }
 0x204   : > { %831 = vmatmul.bf16.gmra.mxu1 %v1467_v21 }
 0x207   : > { %v2200_v17 = vpop.f32.mrf.mxu3 }
 0x208   : > { %900 = vmatmul.bf16.gmra.mxu2 %v1439_v3  ;;  %v542_v3 = vld [vmem:[#allocation2 + $0x50] sm:$0xff] }
 0x209   : > { %v794_v22 = vpop.f32.mrf.mxu1 }
 0x20f   : > { %v2204_v23 = vpop.f32.mrf.mxu3 }
 0x211   : > { %v797_v31 = vpop.f32.mrf.mxu1 }
 0x214   : > { %836 = vmatmul.bf16.gmra.mxu1 %v1475_v30 }
 0x217   : > { %v2208_v26 = vpop.f32.mrf.mxu3 }
 0x218   : > { %905 = vmatmul.bf16.gmra.mxu2 %v1447_v11 }
 0x219   : > { %v799_v37 = vpop.f32.mrf.mxu1 }
 0x21f   : > { %v2212_v35 = vpop.f32.mrf.mxu3 }
 0x221   : > { %v802_v49 = vpop.f32.mrf.mxu1 }
 0x224   : > { %841 = vmatmul.bf16.gmra.mxu1 %v1483_v47 }
 0x227   : > { %v2218_v46 = vpop.f32.mrf.mxu3 }
 0x228   : > { %910 = vmatmul.bf16.gmra.mxu2 %v1455_v20 }
 0x229   : > { %v804_v59 = vpop.f32.mrf.mxu1 }
 0x22f   : > { %v2220_v53 = vpop.f32.mrf.mxu3 }
 0x231   : > { %v807_v7 = vpop.f32.mrf.mxu1 }
 0x238   : > { %915 = vmatmul.bf16.gmra.mxu2 %v1463_v29 }
 0x23b   : > { %v876_v33 = vpop.f32.mrf.mxu2  ;;  %v936_v62 = vpop.f32.mrf.mxu3 }
 0x23c   : > { %v877_v34 = vadd.f32 %v876_v33, %v787_v9  ;;  %v937_v1 = vadd.f32 %v936_v62, %v2194_v10  ;;  %v1487_v10 = vor.u32 %v1566_v14, %v1484_v15  ;;  %v548_v62 = vld [vmem:[#allocation2 + $0xe8] sm:$0xff] }
 0x23e   : > { %v956_v36 = vadd.f32 %v877_v34, %v538_v32  ;;  %v980_v2 = vadd.f32 %v937_v1, %v562_v0  ;;  %v569_v1 = vld [vmem:[#allocation2 + $0x98] sm:$0xff] }
 0x240   : > { %988 = vst [vmem:[#allocation2 + $0xb0] sm:$0xff] %v956_v36 }
 0x241   : > { %1012 = vst [vmem:[#allocation2 + $0xa8] sm:$0xff] %v980_v2 }
 0x243   : > { %v878_v41 = vpop.f32.mrf.mxu2  ;;  %v938_v6 = vpop.f32.mrf.mxu3 }
 0x244   : > { %v879_v44 = vadd.f32 %v878_v41, %v789_v12  ;;  %v939_v9 = vadd.f32 %v938_v6, %v2196_v13  ;;  %v544_v13 = vld [vmem:[#allocation2 + $0x30] sm:$0xff]  ;;  %v549_v6 = vld [vmem:[#allocation2 + $0xb8] sm:$0xff] }
 0x246   : > { %v957_v48 = vadd.f32 %v879_v44, %v539_v40  ;;  %v981_v12 = vadd.f32 %v939_v9, %v563_v8  ;;  %v546_v44 = vld [vmem:[#allocation2 + $0x80] sm:$0xff] }
 0x248   : > { %989 = vst [vmem:[#allocation2] sm:$0xff] %v957_v48  ;;  %920 = vmatmul.bf16.gmra.mxu2 %v1471_v45 }
 0x249   : > { %1013 = vst [vmem:[#allocation2 + $0xd0] sm:$0xff] %v981_v12 }
 0x24b   : > { %v881_v51 = vpop.f32.mrf.mxu2  ;;  %v941_v20 = vpop.f32.mrf.mxu3 }
 0x24c   : > { %v882_v52 = vadd.f32 %v881_v51, %v792_v16  ;;  %v543_v16 = vld [vmem:[#allocation2 + $0x68] sm:$0xff]  ;;  %v942_v25 = vadd.f32 %v941_v20, %v2200_v17  ;;  %v566_v17 = vld [vmem:[#allocation2 + $0xa0] sm:$0xff] }
 0x24d   : > { %v552_v20 = vld [vmem:[#allocation2 + $0x8] sm:$0xff] }
 0x24e   : > { %v958_v54 = vadd.f32 %v882_v52, %v540_v50  ;;  %v982_v27 = vadd.f32 %v942_v25, %v564_v24 }
 0x250   : > { %990 = vst [vmem:[#allocation2 + $0xd8] sm:$0xff] %v958_v54  ;;  %v547_v54 = vld [vmem:[#allocation2 + $0x88] sm:$0xff] }
 0x251   : > { %1014 = vst [vmem:[#allocation2 + $0x10] sm:$0xff] %v982_v27  ;;  %v553_v27 = vld [vmem:[#allocation2 + $0x78] sm:$0xff] }
 0x253   : > { %v883_v58 = vpop.f32.mrf.mxu2  ;;  %v943_v30 = vpop.f32.mrf.mxu3 }
 0x254   : > { %v884_v60 = vadd.f32 %v883_v58, %v794_v22  ;;  %v809_v22 = vpop.f32.mrf.mxu1  ;;  %v944_v32 = vadd.f32 %v943_v30, %v2204_v23 }
 0x256   : > { %v959_v63 = vadd.f32 %v884_v60, %v541_v57 }
 0x258   : > { %991 = vst [vmem:[#allocation2 + $0x18] sm:$0xff] %v959_v63  ;;  %925 = vmatmul.bf16.gmra.mxu2 %v1479_v61 }
 0x25b   : > { %v886_v4 = vpop.f32.mrf.mxu2  ;;  %v946_v40 = vpop.f32.mrf.mxu3 }
 0x25c   : > { %v887_v5 = vadd.f32 %v886_v4, %v797_v31  ;;  %v565_v31 = vld [vmem:[#allocation2 + $0x28] sm:$0xff]  ;;  %v812_v36 = vpop.f32.mrf.mxu1  ;;  %v947_v42 = vadd.f32 %v946_v40, %v2208_v26 }
 0x25d   : > { %v983_v34 = vadd.f32 %v944_v32, %v565_v31  ;;  %v554_v31 = vld [vmem:[#allocation2 + $0x38] sm:$0xff] }
 0x25e   : > { %v960_v11 = vadd.f32 %v887_v5, %v542_v3  ;;  %v984_v43 = vadd.f32 %v947_v42, %v566_v17  ;;  %v556_v17 = vld [vmem:[#allocation2 + $0x40] sm:$0xff] }
 0x25f   : > { %1015 = vst [vmem:[#allocation2 + $0x28] sm:$0xff] %v983_v34 }
 0x260   : > { %992 = vst [vmem:[#allocation2 + $0x50] sm:$0xff] %v960_v11  ;;  %v550_v11 = vld [vmem:[#allocation2 + $0x60] sm:$0xff] }
 0x261   : > { %1016 = vst [vmem:[#allocation2 + $0xa0] sm:$0xff] %v984_v43 }
 0x263   : > { %v888_v18 = vpop.f32.mrf.mxu2  ;;  %v948_v23 = vpop.f32.mrf.mxu3 }
 0x264   : > { %v889_v19 = vadd.f32 %v888_v18, %v799_v37  ;;  %v545_v37 = vld [vmem:[#allocation2 + $0x48] sm:$0xff]  ;;  %v814_v47 = vpop.f32.mrf.mxu1  ;;  %v949_v50 = vadd.f32 %v948_v23, %v2212_v35 }
 0x266   : > { %v961_v21 = vadd.f32 %v889_v19, %v543_v16  ;;  %v551_v16 = vld [vmem:[#allocation2 + $0xf0] sm:$0xff] }
 0x268   : > { %993 = vst [vmem:[#allocation2 + $0x68] sm:$0xff] %v961_v21  ;;  %930 = vmatmul.bf16.gmra.mxu2 %v1487_v10 }
 0x26b   : > { %v891_v28 = vpop.f32.mrf.mxu2  ;;  %v951_v57 = vpop.f32.mrf.mxu3 }
 0x26c   : > { %v892_v29 = vadd.f32 %v891_v28, %v802_v49  ;;  %v567_v49 = vld [vmem:[#allocation2 + $0xf8] sm:$0xff]  ;;  %v817_v58 = vpop.f32.mrf.mxu1  ;;  %v952_v60 = vadd.f32 %v951_v57, %v2218_v46 }
 0x26d   : > { %v985_v52 = vadd.f32 %v949_v50, %v567_v49  ;;  %v558_v50 = vld [vmem:[#allocation2 + $0xe0] sm:$0xff] }
 0x26e   : > { %v962_v33 = vadd.f32 %v892_v29, %v544_v13 }
 0x26f   : > { %1017 = vst [vmem:[#allocation2 + $0xf8] sm:$0xff] %v985_v52 }
 0x270   : > { %994 = vst [vmem:[#allocation2 + $0x30] sm:$0xff] %v962_v33 }
 0x273   : > { %v893_v38 = vpop.f32.mrf.mxu2  ;;  %v953_v35 = vpop.f32.mrf.mxu3 }
 0x274   : > { %v894_v39 = vadd.f32 %v893_v38, %v804_v59  ;;  %v568_v59 = vld [vmem:[#allocation2 + $0x20] sm:$0xff]  ;;  %v954_v2 = vadd.f32 %v953_v35, %v2220_v53  ;;  %v819_v4 = vpop.f32.mrf.mxu1 }
 0x275   : > { %v986_v61 = vadd.f32 %v952_v60, %v568_v59  ;;  %v560_v60 = vld [vmem:[#allocation2 + $0x70] sm:$0xff]  ;;  %v561_v35 = vld [vmem:[#allocation2 + $0xc0] sm:$0xff] }
 0x276   : > { %v963_v41 = vadd.f32 %v894_v39, %v545_v37  ;;  %v987_v5 = vadd.f32 %v954_v2, %v569_v1  ;;  %v555_v37 = vld [vmem:[#allocation2 + $0x58] sm:$0xff] }
 0x277   : > { %1018 = vst [vmem:[#allocation2 + $0x20] sm:$0xff] %v986_v61 }
 0x278   : > { %995 = vst [vmem:[#allocation2 + $0x48] sm:$0xff] %v963_v41 }
 0x279   : > { %1019 = vst [vmem:[#allocation2 + $0x98] sm:$0xff] %v987_v5 }
 0x27b   : > { %v896_v45 = vpop.f32.mrf.mxu2 }
 0x27c   : > { %v897_v48 = vadd.f32 %v896_v45, %v807_v7  ;;  %v822_v46 = vpop.f32.mrf.mxu1  ;;  %v557_v45 = vld [vmem:[#allocation2 + $0xc8] sm:$0xff] }
 0x27e   : > { %v964_v51 = vadd.f32 %v897_v48, %v546_v44 }
 0x280   : > { %996 = vst [vmem:[#allocation2 + $0x80] sm:$0xff] %v964_v51 }
 0x283   : > { %v898_v55 = vpop.f32.mrf.mxu2 }
 0x284   : > { %v899_v56 = vadd.f32 %v898_v55, %v809_v22  ;;  %v824_v19 = vpop.f32.mrf.mxu1 }
 0x286   : > { %v965_v26 = vadd.f32 %v899_v56, %v547_v54  ;;  %v559_v56 = vld [vmem:[#allocation2 + $0x90] sm:$0xff] }
 0x288   : > { %997 = vst [vmem:[#allocation2 + $0x88] sm:$0xff] %v965_v26 }
 0x28b   : > { %v901_v63 = vpop.f32.mrf.mxu2 }
 0x28c   : > { %v902_v0 = vadd.f32 %v901_v63, %v812_v36  ;;  %v827_v24 = vpop.f32.mrf.mxu1 }
 0x28e   : > { %v966_v3 = vadd.f32 %v902_v0, %v548_v62 }
 0x290   : > { %998 = vst [vmem:[#allocation2 + $0xe8] sm:$0xff] %v966_v3 }
 0x293   : > { %v903_v7 = vpop.f32.mrf.mxu2 }
 0x294   : > { %v904_v8 = vadd.f32 %v903_v7, %v814_v47  ;;  %v829_v30 = vpop.f32.mrf.mxu1 }
 0x296   : > { %v967_v9 = vadd.f32 %v904_v8, %v549_v6 }
 0x298   : > { %999 = vst [vmem:[#allocation2 + $0xb8] sm:$0xff] %v967_v9 }
 0x29b   : > { %v906_v12 = vpop.f32.mrf.mxu2 }
 0x29c   : > { %v907_v14 = vadd.f32 %v906_v12, %v817_v58  ;;  %v832_v36 = vpop.f32.mrf.mxu1 }
 0x29e   : > { %v968_v15 = vadd.f32 %v907_v14, %v550_v11 }
 0x2a0   : > { %1000 = vst [vmem:[#allocation2 + $0x60] sm:$0xff] %v968_v15 }
 0x2a3   : > { %v908_v18 = vpop.f32.mrf.mxu2 }
 0x2a4   : > { %v909_v53 = vadd.f32 %v908_v18, %v819_v4  ;;  %v834_v41 = vpop.f32.mrf.mxu1 }
 0x2a6   : > { %v969_v10 = vadd.f32 %v909_v53, %v551_v16 }
 0x2a8   : > { %1001 = vst [vmem:[#allocation2 + $0xf0] sm:$0xff] %v969_v10 }
 0x2ab   : > { %v911_v21 = vpop.f32.mrf.mxu2 }
 0x2ac   : > { %v912_v22 = vadd.f32 %v911_v21, %v822_v46  ;;  %v837_v23 = vpop.f32.mrf.mxu1 }
 0x2ae   : > { %v970_v25 = vadd.f32 %v912_v22, %v552_v20 }
 0x2b0   : > { %1002 = vst [vmem:[#allocation2 + $0x8] sm:$0xff] %v970_v25 }
 0x2b3   : > { %v913_v13 = vpop.f32.mrf.mxu2 }
 0x2b4   : > { %v914_v28 = vadd.f32 %v913_v13, %v824_v19  ;;  %v839_v55 = vpop.f32.mrf.mxu1 }
 0x2b6   : > { %v971_v29 = vadd.f32 %v914_v28, %v553_v27 }
 0x2b8   : > { %1003 = vst [vmem:[#allocation2 + $0x78] sm:$0xff] %v971_v29 }
 0x2bb   : > { %v916_v32 = vpop.f32.mrf.mxu2 }
 0x2bc   : > { %v917_v33 = vadd.f32 %v916_v32, %v827_v24  ;;  %v842_v59 = vpop.f32.mrf.mxu1 }
 0x2be   : > { %v972_v34 = vadd.f32 %v917_v33, %v554_v31 }
 0x2c0   : > { %1004 = vst [vmem:[#allocation2 + $0x38] sm:$0xff] %v972_v34 }
 0x2c3   : > { %v918_v38 = vpop.f32.mrf.mxu2 }
 0x2c4   : > { %v919_v39 = vadd.f32 %v918_v38, %v829_v30  ;;  %v844_v0 = vpop.f32.mrf.mxu1 }
 0x2c6   : > { %v973_v40 = vadd.f32 %v919_v39, %v555_v37 }
 0x2c8   : > { %1005 = vst [vmem:[#allocation2 + $0x58] sm:$0xff] %v973_v40 }
 0x2cb   : > { %v921_v42 = vpop.f32.mrf.mxu2 }
 0x2cc   : > { %v922_v43 = vadd.f32 %v921_v42, %v832_v36 }
 0x2ce   : > { %v974_v44 = vadd.f32 %v922_v43, %v556_v17 }
 0x2d0   : > { %1006 = vst [vmem:[#allocation2 + $0x40] sm:$0xff] %v974_v44 }
 0x2d3   : > { %v923_v47 = vpop.f32.mrf.mxu2 }
 0x2d4   : > { %v924_v48 = vadd.f32 %v923_v47, %v834_v41 }
 0x2d6   : > { %v975_v49 = vadd.f32 %v924_v48, %v557_v45 }
 0x2d8   : > { %1007 = vst [vmem:[#allocation2 + $0xc8] sm:$0xff] %v975_v49 }
 0x2db   : > { %v926_v51 = vpop.f32.mrf.mxu2 }
 0x2dc   : > { %v927_v52 = vadd.f32 %v926_v51, %v837_v23 }
 0x2de   : > { %v976_v54 = vadd.f32 %v927_v52, %v558_v50 }
 0x2e0   : > { %1008 = vst [vmem:[#allocation2 + $0xe0] sm:$0xff] %v976_v54 }
 0x2e3   : > { %v928_v57 = vpop.f32.mrf.mxu2 }
 0x2e4   : > { %v929_v58 = vadd.f32 %v928_v57, %v839_v55 }
 0x2e6   : > { %v977_v26 = vadd.f32 %v929_v58, %v559_v56 }
 0x2e8   : > { %1009 = vst [vmem:[#allocation2 + $0x90] sm:$0xff] %v977_v26 }
 0x2eb   : > { %v931_v61 = vpop.f32.mrf.mxu2 }
 0x2ec   : > { %v932_v62 = vadd.f32 %v931_v61, %v842_v59 }
 0x2ee   : > { %v978_v63 = vadd.f32 %v932_v62, %v560_v60 }
 0x2f0   : > { %1010 = vst [vmem:[#allocation2 + $0x70] sm:$0xff] %v978_v63 }
 0x2f3   : > { %v933_v1 = vpop.f32.mrf.mxu2 }
 0x2f4   : > { %v934_v2 = vadd.f32 %v933_v1, %v844_v0  ;;  %1023 = sbr.rel (%p1520_p7) target bundleno = 787 (0x313), region = 48 }
 0x2f6   : > { %v979_v3 = vadd.f32 %v934_v2, %v561_v35 }
 0x2f8   : > { %1011 = vst [vmem:[#allocation2 + $0xc0] sm:$0xff] %v979_v3 }
 0x2f9   : > { %v1024_v4 = vld [vmem:[#allocation2 + $0xb0] sm:$0xff]  ;;  %v1025_v5 = vld [vmem:[#allocation2] sm:$0xff]  ;;  %v1026_v7 = vld [vmem:[#allocation2 + $0xd8] sm:$0xff] }
 0x2fa   : > { %v2238_v6 = vld [vmem:[%s2345_s3] ss:$0 sm:$0xff]  ;;  %v1027_v8 = vld [vmem:[#allocation2 + $0x18] sm:$0xff]  ;;  %v1028_v9 = vld [vmem:[#allocation2 + $0x50] sm:$0xff] }
 0x2fb   : > { %v1029_v46 = vld [vmem:[#allocation2 + $0x68] sm:$0xff]  ;;  %v1030_v11 = vld [vmem:[#allocation2 + $0x30] sm:$0xff]  ;;  %v1060_v12 = vadd.f32 %v2238_v6, %v1024_v4  ;;  %v1061_v14 = vadd.f32 %v2238_v6, %v1025_v5  ;;  %v1062_v15 = vadd.f32 %v2238_v6, %v1026_v7  ;;  %v1063_v16 = vadd.f32 %v2238_v6, %v1027_v8  ;;  %v1032_v21 = vld [vmem:[#allocation2 + $0x80] sm:$0xff] }
 0x2fc   : > { %v1031_v18 = vld [vmem:[#allocation2 + $0x48] sm:$0xff]  ;;  %v1064_v19 = vadd.f32 %v2238_v6, %v1028_v9  ;;  %v1065_v53 = vadd.f32 %v2238_v6, %v1029_v46  ;;  %v1066_v10 = vadd.f32 %v2238_v6, %v1030_v11  ;;  %v1035_v29 = vld [vmem:[#allocation2 + $0xb8] sm:$0xff]  ;;  %v1036_v34 = vld [vmem:[#allocation2 + $0x60] sm:$0xff]  ;;  %v1068_v39 = vadd.f32 %v2238_v6, %v1032_v21 }
 0x2fd   : > { %v1067_v20 = vadd.f32 %v2238_v6, %v1031_v18  ;;  %v1033_v22 = vld [vmem:[#allocation2 + $0x88] sm:$0xff]  ;;  %v1092_v24 = vmax.f32 %v1060_v12, 0.0  ;;  %v1093_v25 = vmax.f32 %v1061_v14, 0.0  ;;  %v1094_v27 = vmax.f32 %v1062_v15, 0.0  ;;  %v1037_v36 = vld [vmem:[#allocation2 + $0xf0] sm:$0xff]  ;;  %v1039_v17 = vld [vmem:[#allocation2 + $0x78] sm:$0xff] }
 0x2fe   : > { %v1095_v13 = vmax.f32 %v1063_v16, 0.0  ;;  %v1034_v28 = vld [vmem:[#allocation2 + $0xe8] sm:$0xff]  ;;  %v1096_v30 = vmax.f32 %v1064_v19, 0.0  ;;  %v1097_v31 = vmax.f32 %v1065_v53, 0.0  ;;  %v1098_v32 = vmax.f32 %v1066_v10, 0.0  ;;  %v1040_v47 = vld [vmem:[#allocation2 + $0x38] sm:$0xff] }
 0x2ff   : > { %v1099_v33 = vmax.f32 %v1067_v20, 0.0  ;;  %v1580_v37 = vpack.c.bf16 %v1093_v25, %v1092_v24  ;;  %v1069_v40 = vadd.f32 %v2238_v6, %v1033_v22  ;;  %v1038_v41 = vld [vmem:[#allocation2 + $0x8] sm:$0xff]  ;;  %v1070_v44 = vadd.f32 %v2238_v6, %v1034_v28  ;;  %v1041_v51 = vld [vmem:[#allocation2 + $0x58] sm:$0xff]  ;;  %v1042_v57 = vld [vmem:[#allocation2 + $0x40] sm:$0xff] }
 0x300   : > { %v1585_v38 = vpack.c.bf16 %v1095_v13, %v1094_v27  ;;  %v1590_v42 = vpack.c.bf16 %v1097_v31, %v1096_v30  ;;  %v1071_v45 = vadd.f32 %v2238_v6, %v1035_v29  ;;  %v1100_v48 = vmax.f32 %v1068_v39, 0.0  ;;  %v1043_v58 = vld [vmem:[#allocation2 + $0xc8] sm:$0xff]  ;;  %v1044_v62 = vld [vmem:[#allocation2 + $0xe0] sm:$0xff]  ;;  %v1045_v63 = vld [vmem:[#allocation2 + $0x90] sm:$0xff] }
 0x301   : > { %v1595_v43 = vpack.c.bf16 %v1099_v33, %v1098_v32  ;;  %1581 = vst [vmem:[%s2102_s20] sm:$0xff] %v1580_v37   ;;  %v1101_v23 = vmax.f32 %v1069_v40, 0.0  ;;  %v1072_v49 = vadd.f32 %v2238_v6, %v1036_v34  ;;  %v1073_v50 = vadd.f32 %v2238_v6, %v1037_v36  ;;  %v1046_v3 = vld [vmem:[#allocation2 + $0x70] sm:$0xff]  ;;  %v1047_v4 = vld [vmem:[#allocation2 + $0xc0] sm:$0xff]  ;;  %v1048_v46 = vld [vmem:[#allocation2 + $0xa8] sm:$0xff] }
 0x302   : > { %1657 = vst [vmem:[%s2102_s20 + $0x8] sm:$0xff] %v1585_v38   ;;  %v1102_v52 = vmax.f32 %v1070_v44, 0.0  ;;  %v1103_v54 = vmax.f32 %v1071_v45, 0.0  ;;  %v1074_v55 = vadd.f32 %v2238_v6, %v1038_v41  ;;  %v1075_v56 = vadd.f32 %v2238_v6, %v1039_v17  ;;  %v1049_v16 = vld [vmem:[#allocation2 + $0xd0] sm:$0xff]  ;;  %v1051_v21 = vld [vmem:[#allocation2 + $0x28] sm:$0xff]  ;;  %v1052_v13 = vld [vmem:[#allocation2 + $0xa0] sm:$0xff] }
 0x303   : > { %1658 = vst [vmem:[%s2102_s20 + $0x10] sm:$0xff] %v1590_v42   ;;  %v1600_v26 = vpack.c.bf16 %v1101_v23, %v1100_v48  ;;  %v1104_v59 = vmax.f32 %v1072_v49, 0.0  ;;  %v1105_v60 = vmax.f32 %v1073_v50, 0.0  ;;  %v1076_v61 = vadd.f32 %v2238_v6, %v1040_v47  ;;  %v1050_v20 = vld [vmem:[#allocation2 + $0x10] sm:$0xff]  ;;  %v1053_v28 = vld [vmem:[#allocation2 + $0xf8] sm:$0xff]  ;;  %v1054_v33 = vld [vmem:[#allocation2 + $0x20] sm:$0xff] }
 0x304   : > { %1659 = vst [vmem:[%s2102_s20 + $0x18] sm:$0xff] %v1595_v43   ;;  %v1605_v0 = vpack.c.bf16 %v1103_v54, %v1102_v52  ;;  %v1106_v35 = vmax.f32 %v1074_v55, 0.0  ;;  %v1107_v1 = vmax.f32 %v1075_v56, 0.0  ;;  %v1077_v2 = vadd.f32 %v2238_v6, %v1041_v51  ;;  %v1055_v34 = vld [vmem:[#allocation2 + $0x98] sm:$0xff] }
 0x305   : > { %1660 = vst [vmem:[%s2102_s20 + $0x20] sm:$0xff] %v1600_v26   ;;  %v1610_v5 = vpack.c.bf16 %v1105_v60, %v1104_v59  ;;  %v1108_v7 = vmax.f32 %v1076_v61, 0.0  ;;  %v1078_v8 = vadd.f32 %v2238_v6, %v1042_v57  ;;  %v1079_v9 = vadd.f32 %v2238_v6, %v1043_v58 }
 0x306   : > { %1661 = vst [vmem:[%s2102_s20 + $0x28] sm:$0xff] %v1605_v0   ;;  %v1615_v11 = vpack.c.bf16 %v1107_v1, %v1106_v35  ;;  %v1109_v12 = vmax.f32 %v1077_v2, 0.0  ;;  %v1080_v14 = vadd.f32 %v2238_v6, %v1044_v62  ;;  %v1081_v15 = vadd.f32 %v2238_v6, %v1045_v63 }
 0x307   : > { %1662 = vst [vmem:[%s2102_s20 + $0x30] sm:$0xff] %v1610_v5   ;;  %v1110_v18 = vmax.f32 %v1078_v8, 0.0  ;;  %v1111_v19 = vmax.f32 %v1079_v9, 0.0  ;;  %v1082_v53 = vadd.f32 %v2238_v6, %v1046_v3  ;;  %v1083_v10 = vadd.f32 %v2238_v6, %v1047_v4 }
 0x308   : > { %1663 = vst [vmem:[%s2102_s20 + $0x38] sm:$0xff] %v1615_v11   ;;  %v1620_v22 = vpack.c.bf16 %v1109_v12, %v1108_v7  ;;  %v1112_v24 = vmax.f32 %v1080_v14, 0.0  ;;  %v1113_v25 = vmax.f32 %v1081_v15, 0.0  ;;  %v1084_v27 = vadd.f32 %v2238_v6, %v1048_v46 }
 0x309   : > { %v1625_v29 = vpack.c.bf16 %v1111_v19, %v1110_v18  ;;  %v1114_v30 = vmax.f32 %v1082_v53, 0.0  ;;  %v1115_v31 = vmax.f32 %v1083_v10, 0.0  ;;  %v1085_v32 = vadd.f32 %v2238_v6, %v1049_v16 }
 0x30a   : > { %1664 = vst [vmem:[%s2102_s20 + $0x40] sm:$0xff] %v1620_v22   ;;  %v1630_v36 = vpack.c.bf16 %v1113_v25, %v1112_v24  ;;  %v1116_v37 = vmax.f32 %v1084_v27, 0.0  ;;  %v1086_v38 = vadd.f32 %v2238_v6, %v1050_v20  ;;  %v1087_v39 = vadd.f32 %v2238_v6, %v1051_v21 }
 0x30b   : > { %1665 = vst [vmem:[%s2102_s20 + $0x48] sm:$0xff] %v1625_v29   ;;  %v1635_v40 = vpack.c.bf16 %v1115_v31, %v1114_v30  ;;  %v1117_v41 = vmax.f32 %v1085_v32, 0.0  ;;  %v1088_v17 = vadd.f32 %v2238_v6, %v1052_v13  ;;  %v1089_v42 = vadd.f32 %v2238_v6, %v1053_v28 }
 0x30c   : > { %1666 = vst [vmem:[%s2102_s20 + $0x50] sm:$0xff] %v1630_v36   ;;  %v1118_v43 = vmax.f32 %v1086_v38, 0.0  ;;  %v1119_v44 = vmax.f32 %v1087_v39, 0.0  ;;  %v1090_v45 = vadd.f32 %v2238_v6, %v1054_v33  ;;  %v1091_v47 = vadd.f32 %v2238_v6, %v1055_v34 }
 0x30d   : > { %1667 = vst [vmem:[%s2102_s20 + $0x58] sm:$0xff] %v1635_v40   ;;  %v1640_v48 = vpack.c.bf16 %v1117_v41, %v1116_v37  ;;  %v1120_v23 = vmax.f32 %v1088_v17, 0.0  ;;  %v1121_v49 = vmax.f32 %v1089_v42, 0.0 }
 0x30e   : > { %v1645_v50 = vpack.c.bf16 %v1119_v44, %v1118_v43  ;;  %v1122_v51 = vmax.f32 %v1090_v45, 0.0  ;;  %v1123_v52 = vmax.f32 %v1091_v47, 0.0 }
 0x30f   : > { %1668 = vst [vmem:[%s2102_s20 + $0x60] sm:$0xff] %v1640_v48   ;;  %v1650_v54 = vpack.c.bf16 %v1121_v49, %v1120_v23 }
 0x310   : > { %1669 = vst [vmem:[%s2102_s20 + $0x68] sm:$0xff] %v1645_v50   ;;  %v1655_v55 = vpack.c.bf16 %v1123_v52, %v1122_v51 }
 0x311   : > { %1670 = vst [vmem:[%s2102_s20 + $0x70] sm:$0xff] %v1650_v54  }
 0x312   : > { %1671 = vst [vmem:[%s2102_s20 + $0x78] sm:$0xff] %v1655_v55  }
 0x313 PF: > { %s1576_s21 = sshll.u32 %s1938_s22, 7  ;;  %s1201_s26 = sshll.u32 %s2102_s20, 4  ;;  %s1202_s26 = int_to_ptr.vmem [resolvable:$true] %s1201_s26 }
 0x314   : > { %s1200_s6 = scalar_lea.hbm %s2346_s4, %s1576_s21  ;;  %s1189_s17 = scalar_lea.sflag [#allocation5], %s232_s13 }
 0x315   : > { %s1203_s5 = sshll.u32 %s1200_s6, 4  ;;  %s1848_s22 = scalar_lea.hbm %s2346_s4, 256  ;;  %s1204_s5 = int_to_ptr.hbm [resolvable:$true] %s1203_s5 }
 0x316   : > { %s1842_s23 = sshra.s32 %s1204_s5, 4  ;;  %s1843_s23 = int_to_ptr.hbm [resolvable:$true] %s1842_s23 }
 0x317   : > { %s1844_s29 = scalar_lea.hbm %s1843_s23, 128  ;;  %p1849_p13 = scmp.lt.s32.totalorder %s1843_s23, %s2346_s4 }
 0x318   : > { %p1845_p9 = scmp.ne.s32.totalorder %s1843_s23, %s1844_s29  ;;  %p1850_p0 = scmp.lt.s32.totalorder %s1848_s22, %s1844_s29 }
 0x31a   : > { %p1846_p10 = pnand %p1845_p9, %p2065_p12  ;;  %p1851_p1 = por %p1850_p0, %p1849_p13 }
 0x31c   : > { %p1847_p11 = pneg %p1846_p10 }
 0x31e   : > { %p1852_p4 = pnand %p1851_p1, %p1847_p11 }
 0x320   : > { %1855 = shalt.err (!%p1852_p4)
}
 0x321   : > { %s1956_s13 = smov 64   ;;  %s1957_s20 = smov 4  }
 0x322   : > { %1691 = dma.vmem_to_hbm [thread:$0]  (%p2065_p12), %s1202_s26, 2048, %s1204_s5, %s1189_s17, %s1956_s13, %s1956_s13, %s1957_s20  }
 0x323 PF: > { %p1702_p5 = scmp.ge.s32.totalorder %s1950_s25, 2  ;;  %s1218_s10 = sand.u32 1, %s1910_s15  }
 0x324   : > { %s1219_s7 = scalar_lea.sflag [#allocation5], %s1218_s10 }
 0x325   : > { %p1698_p6 = pnand %p1702_p5, %p2078_p2 }
 0x327   : > { %p1699_p8 = pneg %p1698_p6 }
 0x329   : > { %1905 = dma.done.wait (%p1699_p8), %s1219_s7, 2048  }
 0x32a   : > { %1907 = vsyncadd (%p1699_p8), %s1219_s7, 4294965248  ;;  %s20_s25 = sadd.s32 1, %s1950_s25   ;;  %s2366_s30 = sld [smem:[#allocation9_spill]] }
 0x32b   : > { %p17_p3 = scmp.ge.s32.totalorder %s20_s25, 6   ;;  %s2367_s17 = sld [smem:[#allocation14_spill]] }
 0x32c   : > { %s2368_s11 = sld [smem:[#allocation10_spill]]  ;;  %s2373_s15 = smov %s1914_s16 }
 0x32d   : > { %s2369_s20 = sld [smem:[#allocation15_spill]]  ;;  %s2375_s18 = smov %s1926_s19 }
 0x32e   : > { %s2370_s21 = sld [smem:[#allocation11_spill]]  ;;  %s2377_s22 = smov %s1946_s24 }
 0x32f   : > { %s2371_s23 = sld [smem:[#allocation12_spill]] }
 0x330   : > { %s2372_s27 = sld [smem:[#allocation13_spill]]  ;;  %s2374_s16 = smov %s2366_s30 }
 0x332   : > { %s2376_s19 = smov %s2368_s11  ;;  %19 = sbr.rel (!%p17_p3) target bundleno = 9 (0x9), region = 90 }
 0x336   : > { %s2378_s24 = smov %s2372_s27 }
 0x337   :  { %1225 = vsyncpa [#allocation4], 1 }
 0x338   :  { %1227 = vsyncpa [#allocation4 + $0x1], 1 }
 0x339   :  { %1228 = vsyncpa [#allocation5], 1 }
 0x33a   :  { %1230 = vsyncpa [#allocation5 + $0x1], 1 }

</bundles_post_ra>
